<compile_context>
chip_gen: v7x
topology: tpu7x:2x2x1
jax: 0.10.0
libtpu: 0.0.40
codegen_flags: <defaults>
</compile_context>

<pallas_src>
import functools
import math

import jax
import jax.numpy as jnp
from jax.experimental import pallas as pl
from jax.experimental.pallas import tpu as pltpu

LANE = 128
NUM_GROUPS = 8


def _cpad(c):
    return ((c + LANE - 1) // LANE) * LANE


def _pick_tile(n, cap):
    for t in (cap, 512, 256, 128, 64, 32, 16, 8):
        if t <= cap and n % t == 0:
            return t
    return n


# ----------------------------------------------------------------------------
# Pallas kernels
# ----------------------------------------------------------------------------
def _linear_kernel(*refs, has_res):
    if has_res:
        x_ref, w_ref, b_ref, r_ref, o_ref = refs
    else:
        x_ref, w_ref, b_ref, o_ref = refs
        r_ref = None
    acc = jnp.dot(x_ref[...], w_ref[...], preferred_element_type=jnp.float32)
    acc = acc + b_ref[...]
    if has_res:
        acc = acc + r_ref[...].astype(jnp.float32)
    o_ref[...] = acc.astype(o_ref.dtype)


def pallas_linear(x, w, b, residual=None):
    """x: [M, K] bf16, w: [K, N] bf16, b: [1, N] f32 -> [M, N] bf16 (tiled over M).

    Optional residual [M, N] is fused into the epilogue (saves an HBM round trip)."""
    M, K = x.shape
    N = w.shape[1]
    TM = _pick_tile(M, 512)          # choose TM dividing M -> no pad / slice copies
    has_res = residual is not None
    in_specs = [
        pl.BlockSpec((TM, K), lambda i: (i, 0)),
        pl.BlockSpec((K, N), lambda i: (0, 0)),
        pl.BlockSpec((1, N), lambda i: (0, 0)),
    ]
    args = [x, w, b]
    if has_res:
        in_specs.append(pl.BlockSpec((TM, N), lambda i: (i, 0)))
        args.append(residual)
    return pl.pallas_call(
        functools.partial(_linear_kernel, has_res=has_res),
        out_shape=jax.ShapeDtypeStruct((M, N), x.dtype),
        grid=(M // TM,),
        in_specs=in_specs,
        out_specs=pl.BlockSpec((TM, N), lambda i: (i, 0)),
        compiler_params=pltpu.CompilerParams(dimension_semantics=("parallel",)),
    )(*args)


def _conv3x3_kernel(*refs, TH, W, Cin, Cout, has_res):
    if has_res:
        x_hbm, w_ref, b_ref, res_ref, o_ref, xbuf, acc_ref, sem = refs
    else:
        x_hbm, w_ref, b_ref, o_ref, xbuf, acc_ref, sem = refs
        res_ref = None
    b = pl.program_id(0)
    i = pl.program_id(1)
    r0 = pl.multiple_of(i * TH, TH)
    # manual DMA of the halo'd row band (TH + 2 rows) from HBM into VMEM
    cp = pltpu.make_async_copy(x_hbm.at[b, pl.ds(r0, TH + 2)], xbuf, sem.at[0])
    cp.start()
    cp.wait()
    acc_ref[...] = jnp.zeros((TH * W, Cout), jnp.float32)
    for t in range(9):                                # 9 taps, static shifted dots
        di, dj = t // 3, t % 3
        xs = xbuf[di:di + TH, dj:dj + W, :].reshape(TH * W, Cin)
        acc_ref[...] += jnp.dot(xs, w_ref[t], preferred_element_type=jnp.float32)
    acc = acc_ref[...] + b_ref[...]
    if has_res:
        acc = acc + res_ref[0].reshape(TH * W, Cout).astype(jnp.float32)
    o_ref[0] = acc.reshape(TH, W, Cout).astype(o_ref.dtype)


def conv3x3(x, wp, residual=None):
    """Fused 3x3 conv, stride 1, pad 1.  x: [B,H,W,Cin_p] bf16; wp['w9']: [9,Cin_p,Cout_p] bf16."""
    B, H, W, Cin = x.shape
    Cout = wp['w9'].shape[-1]
    xpad = jnp.pad(x, ((0, 0), (1, 1), (1, 1), (0, 0)))   # spatial zero pad only
    TH = _pick_tile(H, 8)
    nt = H // TH
    has_res = residual is not None
    in_specs = [
        pl.BlockSpec(memory_space=pl.ANY),                 # padded input stays in HBM
        pl.BlockSpec((9, Cin, Cout), lambda b, i: (0, 0, 0)),
        pl.BlockSpec((1, Cout), lambda b, i: (0, 0)),
    ]
    args = [xpad, wp['w9'], wp['b']]
    if has_res:
        in_specs.append(pl.BlockSpec((1, TH, W, Cout), lambda b, i: (b, i, 0, 0)))
        args.append(residual)
    kern = functools.partial(_conv3x3_kernel, TH=TH, W=W, Cin=Cin, Cout=Cout,
                             has_res=has_res)
    return pl.pallas_call(
        kern,
        out_shape=jax.ShapeDtypeStruct((B, H, W, Cout), x.dtype),
        grid=(B, nt),
        in_specs=in_specs,
        out_specs=pl.BlockSpec((1, TH, W, Cout), lambda b, i: (b, i, 0, 0)),
        scratch_shapes=[
            pltpu.VMEM((TH + 2, W + 2, Cin), x.dtype),     # halo'd input rows
            pltpu.VMEM((TH * W, Cout), jnp.float32),       # f32 accumulator
            pltpu.SemaphoreType.DMA((1,)),
        ],
        compiler_params=pltpu.CompilerParams(
            dimension_semantics=("parallel", "parallel")),
    )(*args)


def _gn_stats_kernel(x_ref, g_ref, b_ref, mcg_ref, mgc_ref, st_ref, ssum, ssq, *,
                     inv_cnt, eps):
    t = pl.program_id(1)

    @pl.when(t == 0)
    def _():
        ssum[...] = jnp.zeros_like(ssum[...])
        ssq[...] = jnp.zeros_like(ssq[...])

    x = x_ref[0].astype(jnp.float32)                       # (THW, C) f32 stats
    one = jnp.ones((1, x.shape[0]), jnp.float32)           # reduce on the (idle) MXU
    ssum[...] += jnp.dot(one, x, preferred_element_type=jnp.float32)
    ssq[...] += jnp.dot(one, x * x, preferred_element_type=jnp.float32)

    @pl.when(t == pl.num_programs(1) - 1)
    def _():
        mcg = mcg_ref[...]                                 # (C, G) channel->group mask
        mgc = mgc_ref[...]                                 # (G, C)
        gs1 = jnp.dot(ssum[...], mcg, preferred_element_type=jnp.float32)
        gs2 = jnp.dot(ssq[...], mcg, preferred_element_type=jnp.float32)
        gmean = gs1 * inv_cnt
        gvar = jnp.maximum(gs2 * inv_cnt - gmean * gmean, 0.0)
        grstd = jax.lax.rsqrt(gvar + eps)
        mean_c = jnp.dot(gmean, mgc, preferred_element_type=jnp.float32)
        rstd_c = jnp.dot(grstd, mgc, preferred_element_type=jnp.float32)
        scale = rstd_c * g_ref[...]
        shift = b_ref[...] - mean_c * scale
        st_ref[0] = jnp.concatenate([scale, shift], axis=0)   # (2, C)


def _gn_apply_kernel(x_ref, st_ref, o_ref, *, silu):
    x = x_ref[0].astype(jnp.float32)
    scale = st_ref[0, 0:1, :]
    shift = st_ref[0, 1:2, :]
    y = x * scale + shift
    if silu:
        y = y * jax.nn.sigmoid(y)
    o_ref[0] = y.astype(o_ref.dtype)


def pallas_group_norm(x, gp, *, silu, eps=1e-6):
    """x: [B, HW, C_p] bf16; two tiled passes (stats over HW tiles, then normalize+SiLU)."""
    B, HW, C = x.shape
    G = gp['mask_cg'].shape[1]
    THW = _pick_tile(HW, 256)
    nt = HW // THW
    inv_cnt = 1.0 / float(HW * gp['cg_real'])

    stats = pl.pallas_call(
        functools.partial(_gn_stats_kernel, inv_cnt=inv_cnt, eps=eps),
        out_shape=jax.ShapeDtypeStruct((B, 2, C), jnp.float32),
        grid=(B, nt),
        in_specs=[
            pl.BlockSpec((1, THW, C), lambda b, t: (b, t, 0)),
            pl.BlockSpec((1, C), lambda b, t: (0, 0)),
            pl.BlockSpec((1, C), lambda b, t: (0, 0)),
            pl.BlockSpec((C, G), lambda b, t: (0, 0)),
            pl.BlockSpec((G, C), lambda b, t: (0, 0)),
        ],
        out_specs=pl.BlockSpec((1, 2, C), lambda b, t: (b, 0, 0)),
        scratch_shapes=[pltpu.VMEM((1, C), jnp.float32),
                        pltpu.VMEM((1, C), jnp.float32)],
        compiler_params=pltpu.CompilerParams(
            dimension_semantics=("parallel", "arbitrary")),
    )(x, gp['gamma'], gp['beta'], gp['mask_cg'], gp['mask_gc'])

    return pl.pallas_call(
        functools.partial(_gn_apply_kernel, silu=silu),
        out_shape=jax.ShapeDtypeStruct((B, HW, C), x.dtype),
        grid=(B, nt),
        in_specs=[
            pl.BlockSpec((1, THW, C), lambda b, t: (b, t, 0)),
            pl.BlockSpec((1, 2, C), lambda b, t: (b, 0, 0)),
        ],
        out_specs=pl.BlockSpec((1, THW, C), lambda b, t: (b, t, 0)),
        compiler_params=pltpu.CompilerParams(
            dimension_semantics=("parallel", "parallel")),
    )(x, stats)


def _attn_kernel(q_ref, kt_ref, v_ref, o_ref, m_sc, l_sc, acc_sc, *, scale):
    ki = pl.program_id(2)

    @pl.when(ki == 0)
    def _():
        m_sc[...] = jnp.full_like(m_sc[...], -jnp.inf)
        l_sc[...] = jnp.zeros_like(l_sc[...])
        acc_sc[...] = jnp.zeros_like(acc_sc[...])

    q = q_ref[0]                                   # (tq, C)  bf16
    kt = kt_ref[0]                                 # (C, tk)  bf16 (pre-transposed)
    s = jnp.dot(q, kt, preferred_element_type=jnp.float32) * scale
    m_prev = m_sc[...]
    m_new = jnp.maximum(m_prev, jnp.max(s, axis=-1, keepdims=True))
    alpha = jnp.exp(m_prev - m_new)
    p = jnp.exp(s - m_new)
    l_sc[...] = alpha * l_sc[...] + jnp.sum(p, axis=-1, keepdims=True)
    acc_sc[...] = alpha * acc_sc[...] + jnp.dot(
        p.astype(v_ref.dtype), v_ref[0], preferred_element_type=jnp.float32)
    m_sc[...] = m_new

    @pl.when(ki == pl.num_programs(2) - 1)
    def _():
        o_ref[0] = (acc_sc[...] * pl.reciprocal(l_sc[...], approx=True)
                    ).astype(o_ref.dtype)


def pallas_attention(q, k, v, *, scale):
    """Single-head self attention, flash-style online softmax over kv tiles."""
    B, T, C = q.shape
    kt = jnp.swapaxes(k, 1, 2)                     # (B, C, T): plain MXU score matmul
    tq = _pick_tile(T, 256)
    tk = _pick_tile(T, 128)
    return pl.pallas_call(
        functools.partial(_attn_kernel, scale=scale),
        out_shape=jax.ShapeDtypeStruct((B, T, C), q.dtype),
        grid=(B, T // tq, T // tk),
        in_specs=[
            pl.BlockSpec((1, tq, C), lambda b, qi, ki: (b, qi, 0)),
            pl.BlockSpec((1, C, tk), lambda b, qi, ki: (b, 0, ki)),
            pl.BlockSpec((1, tk, C), lambda b, qi, ki: (b, ki, 0)),
        ],
        out_specs=pl.BlockSpec((1, tq, C), lambda b, qi, ki: (b, qi, 0)),
        scratch_shapes=[pltpu.VMEM((tq, 1), jnp.float32),
                        pltpu.VMEM((tq, 1), jnp.float32),
                        pltpu.VMEM((tq, C), jnp.float32)],
        compiler_params=pltpu.CompilerParams(
            dimension_semantics=("parallel", "parallel", "arbitrary")),
    )(q, kt, v)


# ----------------------------------------------------------------------------
# Decoder blocks (wrappers / glue)
# ----------------------------------------------------------------------------
def upsample_nearest_2x(x):
    # pure data movement (nearest-neighbor repeat) -> plain XLA glue
    x = jnp.repeat(x, 2, axis=1)
    x = jnp.repeat(x, 2, axis=2)
    return x


def resnet_block(x, p):
    B, H, W, C = x.shape
    xf = x.reshape(B, H * W, C)
    h = pallas_group_norm(xf, p['norm1'], silu=True).reshape(B, H, W, C)
    h = conv3x3(h, p['conv1'])
    Cm = h.shape[-1]
    h2 = pallas_group_norm(h.reshape(B, H * W, Cm), p['norm2'],
                           silu=True).reshape(B, H, W, Cm)
    if 'shortcut' in p:
        res = pallas_linear(x.reshape(B * H * W, C),
                            p['shortcut']['w'], p['shortcut']['b'])
        res = res.reshape(B, H, W, -1)
    else:
        res = x
    # residual add fused into the conv2 epilogue
    return conv3x3(h2, p['conv2'], residual=res)


def attn_block(x, p):
    B, H, W, C = x.shape
    T = H * W
    xf = x.reshape(B, T, C)
    h = pallas_group_norm(xf, p['gn'], silu=False)
    h2 = h.reshape(B * T, C)
    qkv = pallas_linear(h2, p['qkv']['w'], p['qkv']['b'])       # fused q/k/v, N = 3C
    q = qkv[:, 0 * C:1 * C].reshape(B, T, C)
    k = qkv[:, 1 * C:2 * C].reshape(B, T, C)
    v = qkv[:, 2 * C:3 * C].reshape(B, T, C)
    a = pallas_attention(q, k, v, scale=1.0 / math.sqrt(p['c_real']))
    # residual add fused into the output-projection epilogue
    out = pallas_linear(a.reshape(B * T, C), p['o']['w'], p['o']['b'],
                        residual=xf.reshape(B * T, C))
    return out.reshape(B, H, W, C)


def decoder_forward(h_flat, input_shape, p):
    """TtDecoder: conv_in -> mid(resnet,attn,resnet) -> up blocks -> norm/silu -> conv_out."""
    B, C, H, W = input_shape
    x = h_flat.reshape(B, H, W, h_flat.shape[-1])               # NHWC, padded channels
    x = conv3x3(x, p['conv_in'])
    x = resnet_block(x, p['mid_res1'])
    x = attn_block(x, p['mid_attn'])
    x = resnet_block(x, p['mid_res2'])
    for ub in p['up_blocks']:
        for rp in ub['resnets']:
            x = resnet_block(x, rp)
        if ub['upsample'] is not None:
            x = upsample_nearest_2x(x)
            x = conv3x3(x, ub['upsample'])
    Bo, Ho, Wo, Cp = x.shape
    x = pallas_group_norm(x.reshape(Bo, Ho * Wo, Cp), p['norm_out'],
                          silu=True).reshape(Bo, Ho, Wo, Cp)
    x = conv3x3(x, p['conv_out'])
    Cf = p['out_channels']
    out = x[:, :, :, :Cf].astype(jnp.float32).reshape(Bo * Ho * Wo, Cf)
    return out, [Cf, Ho, Wo]


def autoencoder_kl_forward(hidden_states, input_shape, params):
    """TtAutoencoderKL.forward: post_quant_conv (1x1 conv as linear) -> decoder."""
    B, C, H, W = input_shape
    Cp = _cpad(C)
    # pad latent channels to lane width + cast to bf16 (channels-last, lane-dense)
    h = jnp.pad(hidden_states, ((0, 0), (0, Cp - C))).astype(jnp.bfloat16)
    h = pallas_linear(h, params['post_quant_conv']['w'], params['post_quant_conv']['b'])
    # TODO(synk): ttnn.deallocate / ttnn.sharded_to_interleaved are TT device memory
    #             management ops with no Pallas equivalent; they are no-ops here.
    h, chw = decoder_forward(h, (B, C, H, W), params['decoder'])
    return h, chw


# ----------------------------------------------------------------------------
# Deterministic synthetic parameters (scaled-down SDXL VAE decoder), pre-padded/bf16
# ----------------------------------------------------------------------------
def init_params(key, latent_ch=4, block_out_channels=(32, 64), out_ch=3):
    keys = iter(jax.random.split(key, 64))

    def lin(cin, cout):
        w = jax.random.normal(next(keys), (cin, cout), jnp.float32) / math.sqrt(cin)
        wp = jnp.zeros((_cpad(cin), _cpad(cout)), jnp.float32).at[:cin, :cout].set(w)
        return {'w': wp.astype(jnp.bfloat16),
                'b': jnp.zeros((1, _cpad(cout)), jnp.float32)}

    def conv3p(cin, cout):
        w = jax.random.normal(next(keys), (cout, cin, 3, 3),
                              jnp.float32) / math.sqrt(cin * 9)
        w9 = jnp.transpose(w, (2, 3, 1, 0)).reshape(9, cin, cout)
        wp = jnp.zeros((9, _cpad(cin), _cpad(cout)),
                       jnp.float32).at[:, :cin, :cout].set(w9)
        return {'w9': wp.astype(jnp.bfloat16),
                'b': jnp.zeros((1, _cpad(cout)), jnp.float32)}

    def gn(c):
        cp = _cpad(c)
        cg = c // NUM_GROUPS
        ch = jnp.arange(cp)
        m = ((ch[:, None] // cg == jnp.arange(NUM_GROUPS)[None, :]) &
             (ch[:, None] < c)).astype(jnp.float32)
        return {'gamma': jnp.zeros((1, cp), jnp.float32).at[0, :c].set(1.0),
                'beta': jnp.zeros((1, cp), jnp.float32),
                'mask_cg': m, 'mask_gc': m.T, 'cg_real': cg}

    def qkv(c):
        cp = _cpad(c)
        w = jnp.zeros((cp, 3 * cp), jnp.float32)
        for i in range(3):
            wi = jax.random.normal(next(keys), (c, c), jnp.float32) / math.sqrt(c)
            w = w.at[:c, i * cp:i * cp + c].set(wi)
        return {'w': w.astype(jnp.bfloat16), 'b': jnp.zeros((1, 3 * cp), jnp.float32)}

    def resnet(cin, cout):
        p = {'norm1': gn(cin), 'conv1': conv3p(cin, cout),
             'norm2': gn(cout), 'conv2': conv3p(cout, cout)}
        if cin != cout:
            p['shortcut'] = lin(cin, cout)
        return p

    ch_hi, ch_lo = block_out_channels[-1], block_out_channels[0]
    params = {
        'post_quant_conv': lin(latent_ch, latent_ch),
        'decoder': {
            'conv_in': conv3p(latent_ch, ch_hi),
            'mid_res1': resnet(ch_hi, ch_hi),
            'mid_attn': {'gn': gn(ch_hi), 'qkv': qkv(ch_hi),
                         'o': lin(ch_hi, ch_hi), 'c_real': ch_hi},
            'mid_res2': resnet(ch_hi, ch_hi),
            'up_blocks': [
                {   # up block 0: stays at ch_hi, upsamples 2x
                    'resnets': [resnet(ch_hi, ch_hi), resnet(ch_hi, ch_hi)],
                    'upsample': conv3p(ch_hi, ch_hi),
                },
                {   # up block 1 (last): ch_hi -> ch_lo, no upsample
                    'resnets': [resnet(ch_hi, ch_lo), resnet(ch_lo, ch_lo)],
                    'upsample': None,
                },
            ],
            'norm_out': gn(ch_lo),
            'conv_out': conv3p(ch_lo, out_ch),
            'out_channels': out_ch,
        },
    }
    return params


# ----------------------------------------------------------------------------
if __name__ == "__main__":
    B, C, H, W = 1, 4, 16, 16                  # latent input (NCHW semantics of input_shape)
    key = jax.random.PRNGKey(0)
    # hidden_states in flattened channel-last layout: [B*H*W, C]
    hidden_states = jax.random.normal(key, (B * H * W, C), jnp.float32)

    params = init_params(jax.random.PRNGKey(42))

    out, (Co, Ho, Wo) = autoencoder_kl_forward(hidden_states, (B, C, H, W), params)
    out = jax.block_until_ready(out)

    assert out.shape == (B * Ho * Wo, Co)
    assert (Co, Ho, Wo) == (3, 32, 32)
    assert bool(jnp.all(jnp.isfinite(out)))
    print("KERNEL_OK")
</pallas_src>

<mosaic_0001>
module attributes {stable_mosaic.version = 11 : i64} {
  func.func @_linear_kernel(%arg0: i32, %arg1: memref<256x128xbf16, #tpu.memory_space<vmem>>, %arg2: memref<128x128xbf16, #tpu.memory_space<vmem>>, %arg3: memref<1x128xf32, #tpu.memory_space<vmem>>, %arg4: memref<256x128xbf16, #tpu.memory_space<vmem>>) attributes {dimension_semantics = [#tpu.dimension_semantics<parallel>], iteration_bounds = array<i64: 1>, scalar_prefetch = 0 : i64, scratch_operands = 0 : i64, tpu.core_type = #tpu.core_type<tc>, window_params = [{transform_indices = @transform_0, window_bounds = array<i64: 256, 128>}, {pipeline_mode = #tpu.pipeline_mode<synchronous>, transform_indices = @transform_1, window_bounds = array<i64: 128, 128>}, {pipeline_mode = #tpu.pipeline_mode<synchronous>, transform_indices = @transform_2, window_bounds = array<i64: 1, 128>}, {transform_indices = @transform_3, window_bounds = array<i64: 256, 128>}]} {
    %c0 = arith.constant 0 : index
    %c0_0 = arith.constant 0 : index
    %0 = vector.load %arg1[%c0, %c0_0] : memref<256x128xbf16, #tpu.memory_space<vmem>>, vector<256x128xbf16>
    %c0_1 = arith.constant 0 : index
    %c0_2 = arith.constant 0 : index
    %1 = vector.load %arg2[%c0_1, %c0_2] : memref<128x128xbf16, #tpu.memory_space<vmem>>, vector<128x128xbf16>
    %cst = arith.constant dense<0.000000e+00> : vector<256x128xf32>
    %2 = tpu.matmul %0, %1, %cst {dimension_numbers = #tpu.dot_dimension_numbers<[1], [0], [0], [1], [0, 0, 1, 1], [], []>} : vector<256x128xbf16>, vector<128x128xbf16>, vector<256x128xf32> -> vector<256x128xf32>
    %c0_3 = arith.constant 0 : index
    %c0_4 = arith.constant 0 : index
    %3 = vector.load %arg3[%c0_3, %c0_4] : memref<1x128xf32, #tpu.memory_space<vmem>>, vector<1x128xf32>
    %4 = vector.broadcast %3 : vector<1x128xf32> to vector<256x128xf32>
    %5 = arith.addf %2, %4 : vector<256x128xf32>
    %6 = arith.truncf %5 : vector<256x128xf32> to vector<256x128xbf16>
    %c0_5 = arith.constant 0 : index
    %c0_6 = arith.constant 0 : index
    %7 = vector.load %arg4[%c0_5, %c0_6] : memref<256x128xbf16, #tpu.memory_space<vmem>>, vector<256x128xbf16>
    tpu.vector_store %arg4[%c0_5, %c0_6], %6 {strides = array<i32>} : memref<256x128xbf16, #tpu.memory_space<vmem>>, vector<256x128xbf16>,
    return
  }
  func.func @transform_0(%arg0: i32) -> (i32, i32) {
    %c0_i32 = arith.constant 0 : i32
    %c0_i32_0 = arith.constant 0 : i32
    return %arg0, %c0_i32 : i32, i32
  }
  func.func @transform_1(%arg0: i32) -> (i32, i32) {
    %c0_i32 = arith.constant 0 : i32
    %c0_i32_0 = arith.constant 0 : i32
    %c0_i32_1 = arith.constant 0 : i32
    return %c0_i32, %c0_i32_0 : i32, i32
  }
  func.func @transform_2(%arg0: i32) -> (i32, i32) {
    %c0_i32 = arith.constant 0 : i32
    %c0_i32_0 = arith.constant 0 : i32
    %c0_i32_1 = arith.constant 0 : i32
    return %c0_i32, %c0_i32_0 : i32, i32
  }
  func.func @transform_3(%arg0: i32) -> (i32, i32) {
    %c0_i32 = arith.constant 0 : i32
    %c0_i32_0 = arith.constant 0 : i32
    return %arg0, %c0_i32 : i32, i32
  }
}

</mosaic_0001>

<bundles_post_ra>
// kernel: tpu_custom_call.1
= control target key start
LH: loop header
LB: loop body
LE: loop exit
PB: predicated region body
PF: predicated region fallthrough
CT: control target
= control target key end

     0   :  { %8 = vsyncpa [#allocation3], 0  ;;  %s1062_s0 = inlined_call_operand.hbm [shape: bf16[256,128], index: 0, kind: input, shape index: {}]   ;;  %s1063_s1 = inlined_call_operand.hbm [shape: bf16[128,128], index: 1, kind: input, shape index: {}]   ;;  %s1064_s2 = inlined_call_operand.vmem [shape: f32[1,128], index: 2, kind: input, shape index: {}]   ;;  %s1065_s3 = inlined_call_operand.hbm [shape: bf16[256,128], index: 3, kind: output, shape index: {}]  }
   0x1   :  { %9 = vsyncpa [#allocation6], 0 }
   0x2   :  { %10 = vsyncpa [#allocation4], 0  ;;  %s955_s12 = smov [#allocation2]   ;;  %s883_s16 = scalar_lea.hbm %s1062_s0, 2048 }
   0x3   :  { %s16_s13 = sshll.u32 %s955_s12, 4  ;;  %p884_p0 = scmp.ne.s32.totalorder %s1062_s0, %s883_s16  ;;  %s17_s13 = int_to_ptr.vmem [resolvable:$true] %s16_s13 }
   0x4   :  { %p887_p1 = scmp.lt.u32.totalorder %s883_s16, %s1062_s0 }
   0x6   :  { %p889_p2 = pnand %p887_p1, %p884_p0 }
   0x8   :  { %892 = shalt.err (!%p889_p2)
}
   0x9   :  { %s893_s21 = scalar_lea.vmem %s17_s13, 2048  ;;  %p898_p4 = scmp.lt.s32.totalorder %s17_s13, %s17_s13 }
   0xa   :  { %p894_p3 = scmp.ne.s32.totalorder %s17_s13, %s893_s21  ;;  %p899_p5 = scmp.lt.s32.totalorder %s893_s21, %s893_s21 }
   0xc   :  { %p900_p6 = por %p899_p5, %p898_p4 }
   0xe   :  { %p901_p7 = pnand %p900_p6, %p894_p3 }
  0x10   :  { %904 = shalt.err (!%p901_p7)
}
  0x11   :  { %s956_s22 = smov 64   ;;  %s957_s23 = smov 4  }
  0x12   :  { %22 = dma.hbm_to_vmem [thread:$0]  %s1062_s0, 2048, %s17_s13, [#allocation3], %s956_s22, %s956_s22, %s957_s23  }
  0x13   :  { %s958_s26 = smov [#allocation5]   ;;  %s905_s30 = scalar_lea.hbm %s1063_s1, 1024 }
  0x14   :  { %s28_s27 = sshll.u32 %s958_s26, 4  ;;  %p906_p8 = scmp.ne.s32.totalorder %s1063_s1, %s905_s30  ;;  %s29_s27 = int_to_ptr.vmem [resolvable:$true] %s28_s27 }
  0x15   :  { %p909_p9 = scmp.lt.u32.totalorder %s905_s30, %s1063_s1 }
  0x17   :  { %p911_p10 = pnand %p909_p9, %p906_p8 }
  0x19   :  { %914 = shalt.err (!%p911_p10)
}
  0x1a   :  { %s915_s8 = scalar_lea.vmem %s29_s27, 1024  ;;  %p920_p12 = scmp.lt.s32.totalorder %s29_s27, %s29_s27 }
  0x1b   :  { %p916_p11 = scmp.ne.s32.totalorder %s29_s27, %s915_s8  ;;  %p921_p13 = scmp.lt.s32.totalorder %s915_s8, %s915_s8 }
  0x1d   :  { %p922_p0 = por %p921_p13, %p920_p12 }
  0x1f   :  { %p923_p1 = pnand %p922_p0, %p916_p11 }
  0x21   :  { %926 = shalt.err (!%p923_p1)
}
  0x22   :  { %34 = dma.hbm_to_vmem [thread:$0]  %s1063_s1, 1024, %s29_s27, [#allocation6], %s956_s22, %s956_s22, %s957_s23  }
  0x23   :  { %949 = dma.done.wait [#allocation3], 2048  }
  0x24   :  { %950 = vsyncadd [#allocation3], 4294965248 }
  0x25   :  { %951 = dma.done.wait [#allocation6], 1024  }
  0x26   :  { %952 = vsyncadd [#allocation6], 4294966272  ;;  %v859_v0 = vld [vmem:[#allocation5] sm:$0xff]   ;;  %v860_v1 = vld [vmem:[#allocation5 + $0x8] sm:$0xff]  }
  0x27   :  { %790 = vmatprep.subr.bf16.mxu0 %v859_v0  ;;  %838 = vmatprep.subr.bf16.mxu1 %v859_v0  ;;  %v861_v2 = vld [vmem:[#allocation5 + $0x10] sm:$0xff]   ;;  %v862_v3 = vld [vmem:[#allocation5 + $0x18] sm:$0xff]   ;;  %v867_v4 = vld [vmem:[#allocation2] sm:$0xff]  }
  0x28   :  { %791 = vmatpush3.bf16.msra.mxu0 %v859_v0  ;;  %846 = vmatpush3.bf16.msra.mxu1 %v859_v0  ;;  %v868_v5 = vld [vmem:[#allocation2 + $0x40] sm:$0xff]   ;;  %v864_v7 = vld [vmem:[#allocation5 + $0x28] sm:$0xff]   ;;  %v865_v8 = vld [vmem:[#allocation5 + $0x30] sm:$0xff]  }
  0x29   :  { %792 = vmatprep.subr.bf16.mxu0 %v860_v1  ;;  %839 = vmatprep.subr.bf16.mxu1 %v860_v1  ;;  %v863_v6 = vld [vmem:[#allocation5 + $0x20] sm:$0xff]   ;;  %v866_v9 = vld [vmem:[#allocation5 + $0x38] sm:$0xff]   ;;  %v869_v10 = vld [vmem:[#allocation2 + $0x8] sm:$0xff]  }
  0x2a   :  { %806 = vmatprep.mubr.bf16.mxu0 %v867_v4  ;;  %822 = vmatprep.mubr.bf16.mxu1 %v868_v5  ;;  %v870_v11 = vld [vmem:[#allocation2 + $0x48] sm:$0xff]   ;;  %v871_v12 = vld [vmem:[#allocation2 + $0x10] sm:$0xff]   ;;  %v873_v14 = vld [vmem:[#allocation2 + $0x18] sm:$0xff]  }
  0x2b   :  { %v872_v13 = vld [vmem:[#allocation2 + $0x50] sm:$0xff]   ;;  %v874_v15 = vld [vmem:[#allocation2 + $0x58] sm:$0xff]   ;;  %v875_v16 = vld [vmem:[#allocation2 + $0x20] sm:$0xff]  }
  0x2c   :  { %793 = vmatpush3.bf16.msra.mxu0 %v860_v1  ;;  %847 = vmatpush3.bf16.msra.mxu1 %v860_v1  ;;  %v876_v17 = vld [vmem:[#allocation2 + $0x60] sm:$0xff]   ;;  %v877_v18 = vld [vmem:[#allocation2 + $0x28] sm:$0xff]   ;;  %v879_v20 = vld [vmem:[#allocation2 + $0x30] sm:$0xff]  }
  0x2d   :  { %794 = vmatprep.subr.bf16.mxu0 %v861_v2  ;;  %840 = vmatprep.subr.bf16.mxu1 %v861_v2  ;;  %v878_v19 = vld [vmem:[#allocation2 + $0x68] sm:$0xff]   ;;  %v880_v21 = vld [vmem:[#allocation2 + $0x70] sm:$0xff]   ;;  %v881_v22 = vld [vmem:[#allocation2 + $0x38] sm:$0xff]  }
  0x2e   :  { %v882_v23 = vld [vmem:[#allocation2 + $0x78] sm:$0xff]   ;;  %v1013_v25 = vld [vmem:[%s1064_s2] ss:$0 sm:$0xff]  ;;  %s959_s2 = smov [#allocation7]  }
  0x2f   :  { %s569_s11 = sshll.u32 %s959_s2, 4  ;;  %s570_s11 = int_to_ptr.vmem [resolvable:$true] %s569_s11 }
  0x30   :  { %795 = vmatpush3.bf16.msra.mxu0 %v861_v2  ;;  %848 = vmatpush3.bf16.msra.mxu1 %v861_v2  ;;  %s927_s12 = scalar_lea.vmem %s570_s11, 2048  ;;  %p932_p3 = scmp.lt.s32.totalorder %s570_s11, %s570_s11 }
  0x31   :  { %796 = vmatprep.subr.bf16.mxu0 %v862_v3  ;;  %841 = vmatprep.subr.bf16.mxu1 %v862_v3  ;;  %p928_p2 = scmp.ne.s32.totalorder %s570_s11, %s927_s12  ;;  %p933_p4 = scmp.lt.s32.totalorder %s927_s12, %s927_s12 }
  0x33   :  { %p934_p5 = por %p933_p4, %p932_p3 }
  0x34   :  { %797 = vmatpush3.bf16.msra.mxu0 %v862_v3  ;;  %849 = vmatpush3.bf16.msra.mxu1 %v862_v3 }
  0x35   :  { %798 = vmatprep.subr.bf16.mxu0 %v863_v6  ;;  %842 = vmatprep.subr.bf16.mxu1 %v863_v6  ;;  %p935_p6 = pnand %p934_p5, %p928_p2 }
  0x38   :  { %799 = vmatpush3.bf16.msra.mxu0 %v863_v6  ;;  %850 = vmatpush3.bf16.msra.mxu1 %v863_v6 }
  0x39   :  { %800 = vmatprep.subr.bf16.mxu0 %v864_v7  ;;  %843 = vmatprep.subr.bf16.mxu1 %v864_v7 }
  0x3c   :  { %801 = vmatpush3.bf16.msra.mxu0 %v864_v7  ;;  %851 = vmatpush3.bf16.msra.mxu1 %v864_v7 }
  0x3d   :  { %802 = vmatprep.subr.bf16.mxu0 %v865_v8  ;;  %844 = vmatprep.subr.bf16.mxu1 %v865_v8 }
  0x40   :  { %803 = vmatpush3.bf16.msra.mxu0 %v865_v8  ;;  %852 = vmatpush3.bf16.msra.mxu1 %v865_v8 }
  0x41   :  { %804 = vmatprep.subr.bf16.mxu0 %v866_v9  ;;  %845 = vmatprep.subr.bf16.mxu1 %v866_v9 }
  0x44   :  { %805 = vmatpush3.bf16.msra.mxu0 %v866_v9  ;;  %853 = vmatpush3.bf16.msra.mxu1 %v866_v9 }
  0x47   :  { %807 = vmatmul.mubr.bf16.vlgmr.msra.gmra.mrb[0].mxu0 %v869_v10  ;;  %823 = vmatmul.mubr.bf16.vlgmr.msra.gmra.mrb[0].mxu1 %v870_v11 }
  0x48   :  { %810 = vmatprep.mubr.bf16.mxu0 %v871_v12  ;;  %826 = vmatprep.mubr.bf16.mxu1 %v872_v13 }
  0x4f   :  { %811 = vmatmul.mubr.bf16.gmra.mrb[4].mxu0 %v873_v14  ;;  %827 = vmatmul.mubr.bf16.gmra.mrb[4].mxu1 %v874_v15 }
  0x50   :  { %814 = vmatprep.mubr.bf16.mxu0 %v875_v16  ;;  %830 = vmatprep.mubr.bf16.mxu1 %v876_v17 }
  0x57   :  { %815 = vmatmul.mubr.bf16.gmra.mrb[8].mxu0 %v877_v18  ;;  %831 = vmatmul.mubr.bf16.gmra.mrb[8].mxu1 %v878_v19 }
  0x58   :  { %818 = vmatprep.mubr.bf16.mxu0 %v879_v20  ;;  %834 = vmatprep.mubr.bf16.mxu1 %v880_v21 }
  0x5f   :  { %819 = vmatmul.mubr.bf16.gmra.mrb[12].mxu0 %v881_v22  ;;  %835 = vmatmul.mubr.bf16.gmra.mrb[12].mxu1 %v882_v23 }
 0x11a   :  { %v808_v24 = vpop.f32.mrb[0].mxu0  ;;  %v824_v26 = vpop.f32.mrb[0].mxu1 }
 0x11b   :  { %v277_v27 = vpop.f32.mrb[1].mxu0  ;;  %v341_v28 = vpop.f32.mrb[1].mxu1  ;;  %v286_v31 = vadd.f32 %v808_v24, %v1013_v25  ;;  %v350_v32 = vadd.f32 %v824_v26, %v1013_v25 }
 0x11c   :  { %v809_v29 = vpop.f32.mrb[2].mxu0  ;;  %v825_v30 = vpop.f32.mrb[2].mxu1  ;;  %v278_v37 = vadd.f32 %v1013_v25, %v277_v27  ;;  %v342_v38 = vadd.f32 %v1013_v25, %v341_v28 }
 0x11d   :  { %v289_v33 = vadd.f32 %v809_v29, %v1013_v25  ;;  %v353_v34 = vadd.f32 %v825_v30, %v1013_v25  ;;  %v280_v35 = vpop.f32.mrb[3].mxu0  ;;  %v344_v36 = vpop.f32.mrb[3].mxu1 }
 0x11e   :  { %v281_v39 = vadd.f32 %v1013_v25, %v280_v35  ;;  %v345_v40 = vadd.f32 %v1013_v25, %v344_v36 }
 0x11f   :  { %v679_v41 = vpack.c.bf16 %v289_v33, %v286_v31  ;;  %v719_v42 = vpack.c.bf16 %v353_v34, %v350_v32 }
 0x120   :  { %v674_v43 = vpack.c.bf16 %v281_v39, %v278_v37  ;;  %v714_v44 = vpack.c.bf16 %v345_v40, %v342_v38 }
 0x121   :  { %751 = vst [vmem:[#allocation7 + $0x8] sm:$0xff] %v679_v41   ;;  %759 = vst [vmem:[#allocation7 + $0x48] sm:$0xff] %v719_v42  }
 0x122   :  { %675 = vst [vmem:[#allocation7] sm:$0xff] %v674_v43   ;;  %758 = vst [vmem:[#allocation7 + $0x40] sm:$0xff] %v714_v44   ;;  %v812_v45 = vpop.f32.mrb[4].mxu0  ;;  %v828_v46 = vpop.f32.mrb[4].mxu1 }
 0x123   :  { %v293_v47 = vpop.f32.mrb[5].mxu0  ;;  %v357_v48 = vpop.f32.mrb[5].mxu1  ;;  %v302_v51 = vadd.f32 %v812_v45, %v1013_v25  ;;  %v366_v52 = vadd.f32 %v828_v46, %v1013_v25 }
 0x124   :  { %v813_v49 = vpop.f32.mrb[6].mxu0  ;;  %v829_v50 = vpop.f32.mrb[6].mxu1  ;;  %v294_v57 = vadd.f32 %v1013_v25, %v293_v47  ;;  %v358_v58 = vadd.f32 %v1013_v25, %v357_v48 }
 0x125   :  { %v305_v53 = vadd.f32 %v813_v49, %v1013_v25  ;;  %v369_v54 = vadd.f32 %v829_v50, %v1013_v25  ;;  %v296_v55 = vpop.f32.mrb[7].mxu0  ;;  %v360_v56 = vpop.f32.mrb[7].mxu1 }
 0x126   :  { %v297_v59 = vadd.f32 %v1013_v25, %v296_v55  ;;  %v361_v60 = vadd.f32 %v1013_v25, %v360_v56 }
 0x127   :  { %v689_v61 = vpack.c.bf16 %v305_v53, %v302_v51  ;;  %v729_v62 = vpack.c.bf16 %v369_v54, %v366_v52 }
 0x128   :  { %v684_v63 = vpack.c.bf16 %v297_v59, %v294_v57  ;;  %v724_v0 = vpack.c.bf16 %v361_v60, %v358_v58 }
 0x129   :  { %753 = vst [vmem:[#allocation7 + $0x18] sm:$0xff] %v689_v61   ;;  %761 = vst [vmem:[#allocation7 + $0x58] sm:$0xff] %v729_v62  }
 0x12a   :  { %752 = vst [vmem:[#allocation7 + $0x10] sm:$0xff] %v684_v63   ;;  %760 = vst [vmem:[#allocation7 + $0x50] sm:$0xff] %v724_v0   ;;  %v816_v1 = vpop.f32.mrb[8].mxu0  ;;  %v832_v2 = vpop.f32.mrb[8].mxu1 }
 0x12b   :  { %v309_v3 = vpop.f32.mrb[9].mxu0  ;;  %v373_v4 = vpop.f32.mrb[9].mxu1  ;;  %v318_v7 = vadd.f32 %v816_v1, %v1013_v25  ;;  %v382_v8 = vadd.f32 %v832_v2, %v1013_v25 }
 0x12c   :  { %v817_v5 = vpop.f32.mrb[10].mxu0  ;;  %v833_v6 = vpop.f32.mrb[10].mxu1  ;;  %v310_v13 = vadd.f32 %v1013_v25, %v309_v3  ;;  %v374_v14 = vadd.f32 %v1013_v25, %v373_v4 }
 0x12d   :  { %v321_v9 = vadd.f32 %v817_v5, %v1013_v25  ;;  %v385_v10 = vadd.f32 %v833_v6, %v1013_v25  ;;  %v312_v11 = vpop.f32.mrb[11].mxu0  ;;  %v376_v12 = vpop.f32.mrb[11].mxu1 }
 0x12e   :  { %v313_v15 = vadd.f32 %v1013_v25, %v312_v11  ;;  %v377_v16 = vadd.f32 %v1013_v25, %v376_v12 }
 0x12f   :  { %v699_v17 = vpack.c.bf16 %v321_v9, %v318_v7  ;;  %v739_v18 = vpack.c.bf16 %v385_v10, %v382_v8 }
 0x130   :  { %v694_v19 = vpack.c.bf16 %v313_v15, %v310_v13  ;;  %v734_v20 = vpack.c.bf16 %v377_v16, %v374_v14 }
 0x131   :  { %755 = vst [vmem:[#allocation7 + $0x28] sm:$0xff] %v699_v17   ;;  %763 = vst [vmem:[#allocation7 + $0x68] sm:$0xff] %v739_v18  }
 0x132   :  { %754 = vst [vmem:[#allocation7 + $0x20] sm:$0xff] %v694_v19   ;;  %762 = vst [vmem:[#allocation7 + $0x60] sm:$0xff] %v734_v20   ;;  %v820_v21 = vpop.f32.mrb[12].mxu0  ;;  %v836_v22 = vpop.f32.mrb[12].mxu1 }
 0x133   :  { %v325_v23 = vpop.f32.mrb[13].mxu0  ;;  %v389_v24 = vpop.f32.mrb[13].mxu1  ;;  %v334_v28 = vadd.f32 %v820_v21, %v1013_v25  ;;  %v398_v29 = vadd.f32 %v836_v22, %v1013_v25 }
 0x134   :  { %v821_v26 = vpop.f32.mrb[14].mxu0  ;;  %v837_v27 = vpop.f32.mrb[14].mxu1  ;;  %v326_v34 = vadd.f32 %v1013_v25, %v325_v23  ;;  %v390_v35 = vadd.f32 %v1013_v25, %v389_v24 }
 0x135   :  { %v337_v30 = vadd.f32 %v821_v26, %v1013_v25  ;;  %v401_v31 = vadd.f32 %v837_v27, %v1013_v25  ;;  %v328_v32 = vpop.f32.mrb[15].mxu0  ;;  %v392_v33 = vpop.f32.mrb[15].mxu1 }
 0x136   :  { %v329_v36 = vadd.f32 %v1013_v25, %v328_v32  ;;  %v393_v37 = vadd.f32 %v1013_v25, %v392_v33 }
 0x137   :  { %v709_v38 = vpack.c.bf16 %v337_v30, %v334_v28  ;;  %v749_v39 = vpack.c.bf16 %v401_v31, %v398_v29 }
 0x138   :  { %v704_v40 = vpack.c.bf16 %v329_v36, %v326_v34  ;;  %v744_v41 = vpack.c.bf16 %v393_v37, %v390_v35 }
 0x139   :  { %757 = vst [vmem:[#allocation7 + $0x38] sm:$0xff] %v709_v38   ;;  %765 = vst [vmem:[#allocation7 + $0x78] sm:$0xff] %v749_v39  }
 0x13a   :  { %756 = vst [vmem:[#allocation7 + $0x30] sm:$0xff] %v704_v40   ;;  %764 = vst [vmem:[#allocation7 + $0x70] sm:$0xff] %v744_v41  }
 0x13b   :  { %938 = shalt.err (!%p935_p6)
}
 0x13c   :  { %s939_s15 = scalar_lea.hbm %s1065_s3, 2048 }
 0x13d   :  { %p940_p7 = scmp.ne.s32.totalorder %s1065_s3, %s939_s15  ;;  %p943_p8 = scmp.lt.u32.totalorder %s939_s15, %s1065_s3 }
 0x13f   :  { %p945_p9 = pnand %p943_p8, %p940_p7 }
 0x141   :  { %948 = shalt.err (!%p945_p9)
}
 0x142   :  { %575 = dma.vmem_to_hbm [thread:$0]  %s570_s11, 2048, %s1065_s3, [#allocation4], %s956_s22, %s956_s22, %s957_s23  }
 0x143   :  { %953 = dma.done.wait [#allocation4], 2048  }
 0x144   :  { %954 = vsyncadd [#allocation4], 4294965248 }
 0x145   :  { %579 = vsyncpa [#allocation3], 1 }
 0x146   :  { %580 = vsyncpa [#allocation6], 1 }
 0x147   :  { %581 = vsyncpa [#allocation4], 1 }

</bundles_post_ra>
